<compile_context>
chip_gen: v7x
topology: tpu7x:2x2x1
jax: 0.10.0
libtpu: 0.0.40
codegen_flags: <defaults>
</compile_context>

<pallas_src>
import functools

import jax
import jax.numpy as jnp
from jax import lax
from jax.experimental import pallas as pl
from jax.experimental.pallas import tpu as pltpu

_LANE = 128


def _round_up(v, m):
    return (v + m - 1) // m * m


def _vmem_budget_bytes():
    """Scoped-VMEM budget per generation (conservative default if the query fails)."""
    cap = 64 << 20
    try:
        cap = int(getattr(pltpu.get_tpu_info(), "vmem_capacity_bytes", cap))
    except Exception:
        pass
    if cap >= (96 << 20):     # v5e / v6e: 128 MiB physical VMEM -> generous scoped limit
        return 96 << 20
    return 44 << 20           # v7x: 64 MiB per core -> leave headroom


def _m_tiling(m, tm_cap, sublane):
    """(tm, grid_m) with tm % sublane == 0 (or tm == m).  No host-side padding:
    the last M block may be partial (Pallas masks the out-of-bounds writeback)."""
    if m <= max(256, sublane):            # small batch: one exact full-extent tile
        return m, 1
    tm_cap = max(sublane, _round_up(tm_cap, sublane))
    # >= 2 tiles so the "parallel" M axis actually shards across v7x's two TensorCores.
    grid_m = max(2, pl.cdiv(m, tm_cap))
    tm = _round_up(pl.cdiv(m, grid_m), sublane)
    return tm, pl.cdiv(m, tm)


# ----------------------------- kernels -----------------------------

def _single_k_kernel(x_ref, w_ref, o_ref):
    # x: [TM, K] streamed, w: [K, 128] resident, o: [TM, 128] lane-dense.
    o_ref[...] = jnp.dot(x_ref[...], w_ref[...], preferred_element_type=jnp.float32)


def _multi_k_kernel(x_ref, w_ref, o_ref, *, d, tk):
    # Tiled K reduction; accumulate straight into the resident f32 output block.
    k = pl.program_id(1)

    @pl.when(k == 0)
    def _():
        o_ref[...] = jnp.zeros_like(o_ref)

    x = x_ref[...]
    if d % tk != 0:
        # x is NOT padded in HBM: zero the out-of-range K columns of the last tile.
        col = k * tk + lax.broadcasted_iota(jnp.int32, x.shape, 1)
        x = jnp.where(col < d, x, jnp.zeros_like(x))
    o_ref[...] += jnp.dot(x, w_ref[...], preferred_element_type=jnp.float32)


# ----------------------------- wrapper -----------------------------

def dict_learner_forward(x, weight, *, tm=None, tk=None, compute_dtype=None):
    """Forward of DictLearner: y = x @ weight.T (no bias).

    x:      [M, dict_size]
    weight: [64, dict_size]  (torch nn.Linear layout)
    returns [M, 64] float32
    """
    m, d = x.shape
    out_f, d_w = weight.shape
    assert d == d_w, "x / weight dict_size mismatch"

    if compute_dtype is not None:
        x = x.astype(compute_dtype)
    in_dtype = x.dtype
    itemsize = jnp.dtype(in_dtype).itemsize
    sublane = max(8, 32 // itemsize)              # f32 -> 8, bf16 -> 16

    budget = _vmem_budget_bytes()
    default_tm_cap = 1024 if budget >= (96 << 20) else 512
    n_pad = _round_up(out_f, _LANE)               # lane-dense output stores (64 -> 128)

    w_resident_bytes = d * n_pad * itemsize
    if tk is not None:
        tk_eff = max(_LANE, _round_up(tk, _LANE))
        single_k = tk_eff >= d
    else:
        tk_eff = None
        single_k = w_resident_bytes <= budget // 3   # common DictLearner regime

    if single_k:
        # ---- one full-extent K tile: weight DMA'd once and VMEM-resident ----
        w_t = jnp.pad(weight.T, ((0, 0), (0, n_pad - out_f))).astype(in_dtype)
        per_row = 2 * itemsize * d + 2 * 4 * n_pad        # x + out, double-buffered
        tm_cap = min(tm or default_tm_cap,
                     max(8, (budget - w_resident_bytes) // per_row),
                     max(8, (16 << 20) // max(1, itemsize * d)))
        tm_eff, grid_m = _m_tiling(m, tm_cap, sublane)

        out = pl.pallas_call(
            _single_k_kernel,
            out_shape=jax.ShapeDtypeStruct((m, n_pad), jnp.float32),
            grid_spec=pltpu.PrefetchScalarGridSpec(
                num_scalar_prefetch=0,
                grid=(grid_m,),
                in_specs=[
                    pl.BlockSpec((tm_eff, d), lambda i: (i, 0)),      # x streams
                    pl.BlockSpec((d, n_pad), lambda i: (0, 0)),       # weight resident
                ],
                out_specs=pl.BlockSpec((tm_eff, n_pad), lambda i: (i, 0)),
            ),
            compiler_params=pltpu.CompilerParams(
                dimension_semantics=("parallel",),
                vmem_limit_bytes=budget,
            ),
        )(x, w_t)
    else:
        # ---- very large dict_size: tiled K reduction, remainder masked in-kernel ----
        if tk_eff is None:
            tk_eff = 4096
            for cand in range(min(4096, _round_up(d, _LANE)), _LANE - 1, -_LANE):
                if d % cand == 0:              # prefer an exact divisor: no mask needed
                    tk_eff = cand
                    break
        grid_k = pl.cdiv(d, tk_eff)
        # Weight is tiny: pad its K axis (host-side, one-time) so partial weight blocks
        # never read garbage; x remains unpadded and its remainder is masked in-kernel.
        w_t = jnp.pad(weight.T,
                      ((0, grid_k * tk_eff - d), (0, n_pad - out_f))).astype(in_dtype)

        per_row = 2 * itemsize * tk_eff + 2 * 4 * n_pad
        tm_cap = min(tm or default_tm_cap,
                     max(8, (budget - 2 * tk_eff * n_pad * itemsize) // per_row))
        tm_eff, grid_m = _m_tiling(m, tm_cap, sublane)

        kernel = functools.partial(_multi_k_kernel, d=d, tk=tk_eff)
        out = pl.pallas_call(
            kernel,
            out_shape=jax.ShapeDtypeStruct((m, n_pad), jnp.float32),
            grid_spec=pltpu.PrefetchScalarGridSpec(
                num_scalar_prefetch=0,
                grid=(grid_m, grid_k),
                in_specs=[
                    pl.BlockSpec((tm_eff, tk_eff), lambda i, k: (i, k)),
                    pl.BlockSpec((tk_eff, n_pad), lambda i, k: (k, 0)),
                ],
                out_specs=pl.BlockSpec((tm_eff, n_pad), lambda i, k: (i, 0)),
            ),
            compiler_params=pltpu.CompilerParams(
                dimension_semantics=("parallel", "arbitrary"),
                vmem_limit_bytes=budget,
            ),
        )(x, w_t)

    # Consumers that accept the 128-lane-padded activation can skip this cheap slice.
    return out[:, :out_f]


if __name__ == "__main__":
    key = jax.random.PRNGKey(0)
    kx1, kw1, kx2, kw2, kx3, kw3 = jax.random.split(key, 6)

    # 1) Small shapes implied by the module: dict_size=32 -> 64 features, batch=8.
    dict_size, batch = 32, 8
    bound = 1.0 / (dict_size ** 0.5)
    w1 = jax.random.uniform(kw1, (64, dict_size), jnp.float32, -bound, bound)
    x1 = jax.random.normal(kx1, (batch, dict_size), jnp.float32)
    y1 = dict_learner_forward(x1, w1)
    jax.block_until_ready(y1)
    assert y1.shape == (batch, 64)
    assert jnp.allclose(y1, x1 @ w1.T, atol=1e-5, rtol=1e-5)

    # 2) Non-aligned dict_size / batch, resident-weight single-K-tile path (no padding of x).
    d2, b2 = 200, 10
    bound2 = 1.0 / (d2 ** 0.5)
    w2 = jax.random.uniform(kw2, (64, d2), jnp.float32, -bound2, bound2)
    x2 = jax.random.normal(kx2, (b2, d2), jnp.float32)
    y2 = dict_learner_forward(x2, w2)
    jax.block_until_ready(y2)
    assert y2.shape == (b2, 64)
    assert jnp.allclose(y2, x2 @ w2.T, atol=1e-4, rtol=1e-4)

    # 3) Force the tiled-K reduction path + M tiling with partial edge blocks
    #    (exercises the in-kernel K-remainder mask and direct-into-o_ref accumulation).
    d3, b3 = 200, 300
    bound3 = 1.0 / (d3 ** 0.5)
    w3 = jax.random.uniform(kw3, (64, d3), jnp.float32, -bound3, bound3)
    x3 = jax.random.normal(kx3, (b3, d3), jnp.float32)
    y3 = dict_learner_forward(x3, w3, tm=512, tk=128)   # grid = (2 M tiles, 2 K tiles)
    jax.block_until_ready(y3)
    assert y3.shape == (b3, 64)
    assert jnp.allclose(y3, x3 @ w3.T, atol=1e-4, rtol=1e-4)

    # 4) Optional bf16-streamed operands (f32 accumulation) smoke test.
    y1_bf16 = dict_learner_forward(x1, w1, compute_dtype=jnp.bfloat16)
    jax.block_until_ready(y1_bf16)
    assert jnp.allclose(y1_bf16, x1 @ w1.T, atol=5e-2, rtol=5e-2)

    print("KERNEL_OK")
</pallas_src>

<mosaic_0001>
module attributes {stable_mosaic.version = 11 : i64} {
  func.func @_single_k_kernel(%arg0: i32, %arg1: memref<8x32xf32, #tpu.memory_space<vmem>>, %arg2: memref<32x128xf32, #tpu.memory_space<vmem>>, %arg3: memref<8x128xf32, #tpu.memory_space<vmem>>) attributes {dimension_semantics = [#tpu.dimension_semantics<parallel>], iteration_bounds = array<i64: 1>, scalar_prefetch = 0 : i64, scratch_operands = 0 : i64, tpu.core_type = #tpu.core_type<tc>, window_params = [{transform_indices = @transform_0, window_bounds = array<i64: 8, 32>}, {pipeline_mode = #tpu.pipeline_mode<synchronous>, transform_indices = @transform_1, window_bounds = array<i64: 32, 128>}, {transform_indices = @transform_2, window_bounds = array<i64: 8, 128>}]} {
    %c0 = arith.constant 0 : index
    %c0_0 = arith.constant 0 : index
    %0 = vector.load %arg1[%c0, %c0_0] : memref<8x32xf32, #tpu.memory_space<vmem>>, vector<8x32xf32>
    %c0_1 = arith.constant 0 : index
    %c0_2 = arith.constant 0 : index
    %1 = vector.load %arg2[%c0_1, %c0_2] : memref<32x128xf32, #tpu.memory_space<vmem>>, vector<32x128xf32>
    %cst = arith.constant dense<0.000000e+00> : vector<8x128xf32>
    %2 = tpu.matmul %0, %1, %cst {dimension_numbers = #tpu.dot_dimension_numbers<[1], [0], [0], [1], [0, 0, 1, 1], [], []>} : vector<8x32xf32>, vector<32x128xf32>, vector<8x128xf32> -> vector<8x128xf32>
    %c0_3 = arith.constant 0 : index
    %c0_4 = arith.constant 0 : index
    %3 = vector.load %arg3[%c0_3, %c0_4] : memref<8x128xf32, #tpu.memory_space<vmem>>, vector<8x128xf32>
    tpu.vector_store %arg3[%c0_3, %c0_4], %2 {strides = array<i32>} : memref<8x128xf32, #tpu.memory_space<vmem>>, vector<8x128xf32>,
    return
  }
  func.func @transform_0(%arg0: i32) -> (i32, i32) {
    %c0_i32 = arith.constant 0 : i32
    %c0_i32_0 = arith.constant 0 : i32
    return %arg0, %c0_i32 : i32, i32
  }
  func.func @transform_1(%arg0: i32) -> (i32, i32) {
    %c0_i32 = arith.constant 0 : i32
    %c0_i32_0 = arith.constant 0 : i32
    %c0_i32_1 = arith.constant 0 : i32
    return %c0_i32, %c0_i32_0 : i32, i32
  }
  func.func @transform_2(%arg0: i32) -> (i32, i32) {
    %c0_i32 = arith.constant 0 : i32
    %c0_i32_0 = arith.constant 0 : i32
    return %arg0, %c0_i32 : i32, i32
  }
}

</mosaic_0001>

<bundles_post_ra>
// kernel: tpu_custom_call.1
= control target key start
LH: loop header
LB: loop body
LE: loop exit
PB: predicated region body
PF: predicated region fallthrough
CT: control target
= control target key end

     0   :  { %7 = vsyncpa [#allocation3], 0  ;;  %s303_s0 = inlined_call_operand.hbm [shape: f32[8,32], index: 0, kind: input, shape index: {}]   ;;  %s304_s1 = inlined_call_operand.hbm [shape: f32[32,128], index: 1, kind: input, shape index: {}]   ;;  %s305_s2 = inlined_call_operand.hbm [shape: f32[8,128], index: 2, kind: output, shape index: {}]  }
   0x1   :  { %8 = vsyncpa [#allocation6], 0 }
   0x2   :  { %9 = vsyncpa [#allocation4], 0  ;;  %s237_s9 = smov [#allocation2]   ;;  %s238_s11 = smov [#allocation5]  }
   0x3   :  { %s16_s10 = sshll.u32 %s237_s9, 4  ;;  %s25_s12 = sshll.u32 %s238_s11, 4  ;;  %s17_s10 = int_to_ptr.vmem [resolvable:$true] %s16_s10  ;;  %s260_s12 = int_to_ptr.vmem [resolvable:$true] %s25_s12 }
   0x4   :  { %s165_s15 = scalar_lea.hbm %s303_s0, 128 }
   0x5   :  { %p166_p0 = scmp.ne.s32.totalorder %s303_s0, %s165_s15  ;;  %p169_p1 = scmp.lt.u32.totalorder %s165_s15, %s303_s0 }
   0x7   :  { %p171_p2 = pnand %p169_p1, %p166_p0 }
   0x9   :  { %174 = shalt.err (!%p171_p2)
}
   0xa   :  { %s175_s20 = scalar_lea.vmem %s17_s10, 128  ;;  %p180_p4 = scmp.lt.s32.totalorder %s17_s10, %s17_s10 }
   0xb   :  { %p176_p3 = scmp.ne.s32.totalorder %s17_s10, %s175_s20  ;;  %p181_p5 = scmp.lt.s32.totalorder %s175_s20, %s175_s20 }
   0xd   :  { %p182_p6 = por %p181_p5, %p180_p4 }
   0xf   :  { %p183_p7 = pnand %p182_p6, %p176_p3 }
  0x11   :  { %186 = shalt.err (!%p183_p7)
}
  0x12   :  { %19 = dma.hbm_to_vmem [thread:$0]  %s303_s0, 128, %s17_s10, [#allocation3]  }
  0x13   :  { %s187_s25 = scalar_lea.hbm %s304_s1, 512 }
  0x14   :  { %p188_p8 = scmp.ne.s32.totalorder %s304_s1, %s187_s25  ;;  %p191_p9 = scmp.lt.u32.totalorder %s187_s25, %s304_s1 }
  0x16   :  { %p193_p10 = pnand %p191_p9, %p188_p8 }
  0x18   :  { %196 = shalt.err (!%p193_p10)
}
  0x19   :  { %s197_s30 = scalar_lea.vmem %s260_s12, 512  ;;  %p202_p12 = scmp.lt.s32.totalorder %s260_s12, %s260_s12 }
  0x1a   :  { %p198_p11 = scmp.ne.s32.totalorder %s260_s12, %s197_s30  ;;  %p203_p13 = scmp.lt.s32.totalorder %s197_s30, %s197_s30 }
  0x1c   :  { %p204_p0 = por %p203_p13, %p202_p12 }
  0x1e   :  { %p205_p1 = pnand %p204_p0, %p198_p11 }
  0x20   :  { %208 = shalt.err (!%p205_p1)
}
  0x21   :  { %s239_s0 = smov 128   ;;  %s240_s3 = smov 8  }
  0x22   :  { %31 = dma.hbm_to_vmem [thread:$0]  %s304_s1, 512, %s260_s12, [#allocation6], %s239_s0, %s239_s0, %s240_s3  }
  0x23   :  { %231 = dma.done.wait [#allocation3], 128  }
  0x24   :  { %232 = vsyncadd [#allocation3], 4294967168 }
  0x25   :  { %233 = dma.done.wait [#allocation6], 512  }
  0x26   :  { %234 = vsyncadd [#allocation6], 4294966784  ;;  %v241_v0 = vmov 0.0|0.0   ;;  %vm242_vm0 = vmmov 0   ;;  %v243_v1 = vmov 0.0   ;;  %v39_v2 = vld [vmem:[#allocation5] sm:$0xff] }
  0x27   :  { %151 = vmatprep.subr.bf16.mxu0 %v241_v0  ;;  %148 = vmatprep.mubr.msk.f32.mxu0 %vm242_vm0, %v243_v1  ;;  %v40_v3 = vld [vmem:[#allocation5 + $0x8] sm:$0xff]  ;;  %v41_v4 = vld [vmem:[#allocation5 + $0x10] sm:$0xff]  ;;  %v42_v6 = vld [vmem:[#allocation5 + $0x18] sm:$0xff]  ;;  %vm43_vm1 = vcmask 261120   ;;  %s244_s1 = smov [#allocation7]  }
  0x28   :  { %v152_v5 = vpack.c.bf16 %v40_v3, %v39_v2  ;;  %v155_v7 = vpack.c.bf16 %v42_v6, %v41_v4  ;;  %v38_v8 = vld [vmem:[#allocation2] sm:$0xff]  ;;  %s124_s6 = sshll.u32 %s244_s1, 4  ;;  %s125_s6 = int_to_ptr.vmem [resolvable:$true] %s124_s6 }
  0x29   :  { %s209_s7 = scalar_lea.vmem %s125_s6, 128  ;;  %p214_p3 = scmp.lt.s32.totalorder %s125_s6, %s125_s6 }
  0x2a   :  { %153 = vmatpush3.bf16.msra.mxu0 %v152_v5  ;;  %p210_p2 = scmp.ne.s32.totalorder %s125_s6, %s209_s7  ;;  %p215_p4 = scmp.lt.s32.totalorder %s209_s7, %s209_s7 }
  0x2b   :  { %154 = vmatprep.subr.bf16.mxu0 %v241_v0 }
  0x2c   :  { %p216_p5 = por %p215_p4, %p214_p3 }
  0x2e   :  { %156 = vmatpush3.bf16.msra.mxu0 %v155_v7  ;;  %p217_p6 = pnand %p216_p5, %p210_p2 }
  0x31   :  { %149 = vmatmul.mubr.msk.f32.vlgmr.msra.gmra.mrb[0].mxu0 %vm43_vm1, %v38_v8 }
 0x104   :  { %v113_v9 = vpop.f32.mrb[0].mxu0 }
 0x105   :  { %117 = vst [vmem:[#allocation7] sm:$0xff] %v113_v9  ;;  %v150_v10 = vpop.f32.mrb[1].mxu0 }
 0x106   :  { %220 = shalt.err (!%p217_p6)
}
 0x107   :  { %s221_s10 = scalar_lea.hbm %s305_s2, 128 }
 0x108   :  { %p222_p7 = scmp.ne.s32.totalorder %s305_s2, %s221_s10  ;;  %p225_p8 = scmp.lt.u32.totalorder %s221_s10, %s305_s2 }
 0x10a   :  { %p227_p9 = pnand %p225_p8, %p222_p7 }
 0x10c   :  { %230 = shalt.err (!%p227_p9)
}
 0x10d   :  { %127 = dma.vmem_to_hbm [thread:$0]  %s125_s6, 128, %s305_s2, [#allocation4]  }
 0x10e   :  { %235 = dma.done.wait [#allocation4], 128  }
 0x10f   :  { %236 = vsyncadd [#allocation4], 4294967168 }
 0x110   :  { %131 = vsyncpa [#allocation3], 1 }
 0x111   :  { %132 = vsyncpa [#allocation6], 1 }
 0x112   :  { %133 = vsyncpa [#allocation4], 1 }

</bundles_post_ra>
